<compile_context>
chip_gen: v7x
topology: tpu7x:2x2x1
jax: 0.10.0
libtpu: 0.0.40
codegen_flags: <defaults>
</compile_context>

<pallas_src>
import jax
import jax.numpy as jnp
from jax import lax
from jax.experimental import pallas as pl
from jax.experimental.pallas import tpu as pltpu


# Large finite negative instead of -inf: identical softmax under a strict
# causal mask, but no -inf - -inf = NaN if reused with fully-masked rows.
_MASK_VALUE = -1e30


def _mha_head_kernel(x_ref, wqkv_ref, bqkv_ref, wo_ref, bo_ref, y_ref):
    """Grid = (batch_blocks, num_heads); one step = one head of one batch block.

    x_ref    : (Bblk, T, C)  bf16  streamed per batch block
    wqkv_ref : (H, C, 3D)    bf16  resident (constant index map -> DMA'd once)
    bqkv_ref : (H, 1, 3D)    f32   resident
    wo_ref   : (H, D, C)     bf16  resident
    bo_ref   : (1, C)        f32   resident
    y_ref    : (Bblk, T, C)  f32   resident across the head axis (accumulator)
    """
    h = pl.program_id(1)
    bblk, t, c = x_ref.shape
    d = wo_ref.shape[1]
    scale = jnp.float32(1.0) / jnp.sqrt(jnp.float32(d))

    x2 = x_ref[...].reshape(bblk * t, c)                          # bf16 (Bblk*T, C)

    # Fused per-head Q/K/V projection: one (Bblk*T, C) @ (C, 3D) MXU matmul,
    # bf16 operands, f32 accumulate.
    qkv = jnp.dot(x2, wqkv_ref[h], preferred_element_type=jnp.float32)
    qkv = qkv + bqkv_ref[h]                                       # (Bblk*T, 3D) f32

    # Fold 1/sqrt(D) into q (O(T*D) multiplies instead of O(T*T)).
    q = (qkv[:, 0 * d:1 * d] * scale).reshape(bblk, t, d).astype(jnp.bfloat16)
    k = qkv[:, 1 * d:2 * d].reshape(bblk, t, d).astype(jnp.bfloat16)
    v = qkv[:, 2 * d:3 * d].reshape(bblk, t, d).astype(jnp.bfloat16)

    # Attention logits on the MXU, batched over the batch block.
    logits = jnp.einsum("bqd,bkd->bqk", q, k,
                        preferred_element_type=jnp.float32)       # (Bblk, T, T)

    row = lax.broadcasted_iota(jnp.int32, (t, t), 0)
    col = lax.broadcasted_iota(jnp.int32, (t, t), 1)
    logits = jnp.where(col > row, jnp.float32(_MASK_VALUE), logits)

    # Numerically stable softmax in f32; reciprocal goes to the EUP slot.
    # NOTE: approx reciprocal gives ~1e-3 relative error (rows don't sum to
    # exactly 1) -- fine for inference, covered by the test tolerance.
    m = jnp.max(logits, axis=-1, keepdims=True)
    p = jnp.exp(logits - m)
    denom = jnp.sum(p, axis=-1, keepdims=True)
    attn = p * pl.reciprocal(denom, approx=True)                  # (Bblk, T, T) f32

    out_h = jnp.einsum("bqk,bkd->bqd", attn.astype(jnp.bfloat16), v,
                       preferred_element_type=jnp.float32)        # (Bblk, T, D)

    # This head's contribution through its Wo row slice: no concat, no
    # in-kernel per-head lane slicing of the output.
    contrib = jnp.dot(out_h.reshape(bblk * t, d).astype(jnp.bfloat16),
                      wo_ref[h], preferred_element_type=jnp.float32
                      ).reshape(bblk, t, c)

    # Accumulate directly into the resident output block (no scratch).
    # Correct because the head axis is the innermost grid axis and "arbitrary".
    @pl.when(h == 0)
    def _():
        y_ref[...] = contrib.astype(y_ref.dtype)

    @pl.when(h > 0)
    def _():
        y_ref[...] = y_ref[...] + contrib.astype(y_ref.dtype)

    @pl.when(h == pl.num_programs(1) - 1)
    def _():
        y_ref[...] = y_ref[...] + bo_ref[...].astype(y_ref.dtype)


def _vmem_bytes_estimate(bb, T, C, D, H):
    """Rough per-step VMEM working set (double-buffered blocks + intermediates)."""
    x_b = 2 * bb * T * C * 2                      # x block, bf16, 2 buffers
    y_b = 2 * bb * T * C * 4                      # y block, f32, 2 buffers
    w_b = 2 * (H * C * 3 * D + H * D * C) * 2     # packed weights, bf16, 2 buffers
    inter = (bb * T * T * 4 * 2                   # logits + p (f32)
             + bb * T * 3 * D * 4 * 2             # qkv + casts
             + bb * T * C * 4)                    # contrib
    return x_b + y_b + w_b + inter


def _pick_batch_block(B, T, C, D, H, target_rows, vmem_budget_bytes):
    """Largest batch block that fits the budget; prefer the smallest one that
    still gives >= target_rows MXU M-rows per grid step."""
    divisors = [d for d in range(1, B + 1) if B % d == 0]
    fitting = [d for d in divisors
               if _vmem_bytes_estimate(d, T, C, D, H) <= vmem_budget_bytes]
    if not fitting:
        return 1
    big_enough = [d for d in fitting if d * T >= target_rows]
    return min(big_enough) if big_enough else max(fitting)


def masked_self_attention(x, params, num_heads, *, batch_block=None,
                          vmem_limit_bytes=None):
    """x: (B, T, C) float32. params: (in, out) weights (= W_pytorch.T), (C,) biases."""
    B, T, C = x.shape
    assert C % num_heads == 0, "h_dim must be a multiple of num_heads"
    H = num_heads
    D = C // H

    if batch_block is None:
        # Target >=512 MXU M-rows per grid step inside a v7x-safe VMEM budget
        # (64 MiB/TC; v5e/v6e have 128 MiB and can use a larger budget).
        batch_block = _pick_batch_block(B, T, C, D, H,
                                        target_rows=512,
                                        vmem_budget_bytes=40 << 20)
    batch_block = min(batch_block, B)
    assert B % batch_block == 0, "B must be divisible by batch_block"

    if vmem_limit_bytes is None:
        est = _vmem_bytes_estimate(batch_block, T, C, D, H)
        # v7x-safe cap; on v5e/v6e this can be raised to ~96 MiB.
        vmem_limit_bytes = int(min(max(2 * est, 32 << 20), 64 << 20))

    cd = jnp.bfloat16  # MXU operand dtype; accumulation stays f32.

    # Host-side layout plumbing (one-time): pack per-head Q/K/V weight columns
    # into one fused (H, C, 3D) operand and Wo into per-head row slices.
    x_c = x.astype(cd)
    wq_h = params["wq"].reshape(C, H, D).transpose(1, 0, 2)            # (H, C, D)
    wk_h = params["wk"].reshape(C, H, D).transpose(1, 0, 2)
    wv_h = params["wv"].reshape(C, H, D).transpose(1, 0, 2)
    wqkv = jnp.concatenate([wq_h, wk_h, wv_h], axis=-1).astype(cd)     # (H, C, 3D)
    bq_h = params["bq"].reshape(H, 1, D)
    bk_h = params["bk"].reshape(H, 1, D)
    bv_h = params["bv"].reshape(H, 1, D)
    bqkv = jnp.concatenate([bq_h, bk_h, bv_h], axis=-1).astype(jnp.float32)  # (H,1,3D)
    wo_h = params["wo"].reshape(H, D, C).astype(cd)                    # (H, D, C)
    bo_2 = params["bo"].reshape(1, C).astype(jnp.float32)              # (1, C)

    grid = (B // batch_block, H)

    x_spec = pl.BlockSpec((batch_block, T, C), lambda b, h: (b, 0, 0))
    wqkv_spec = pl.BlockSpec((H, C, 3 * D), lambda b, h: (0, 0, 0))    # resident
    bqkv_spec = pl.BlockSpec((H, 1, 3 * D), lambda b, h: (0, 0, 0))
    wo_spec = pl.BlockSpec((H, D, C), lambda b, h: (0, 0, 0))
    bo_spec = pl.BlockSpec((1, C), lambda b, h: (0, 0))
    y_spec = pl.BlockSpec((batch_block, T, C), lambda b, h: (b, 0, 0))

    return pl.pallas_call(
        _mha_head_kernel,
        out_shape=jax.ShapeDtypeStruct((B, T, C), x.dtype),
        grid_spec=pltpu.PrefetchScalarGridSpec(
            num_scalar_prefetch=0,
            grid=grid,
            in_specs=[x_spec, wqkv_spec, bqkv_spec, wo_spec, bo_spec],
            out_specs=y_spec,
        ),
        compiler_params=pltpu.CompilerParams(
            # Batch-block axis sharded across TensorCores (v7x has 2/chip);
            # head axis is a reduction into the resident output -> "arbitrary".
            dimension_semantics=("parallel", "arbitrary"),
            vmem_limit_bytes=vmem_limit_bytes,
        ),
    )(x_c, wqkv, bqkv, wo_h, bo_2)


def init_params(key, h_dim):
    """Deterministic synthetic params. Weights are (in, out) = W_pytorch.T."""
    ks = jax.random.split(key, 8)
    s = 1.0 / jnp.sqrt(jnp.float32(h_dim))

    def w(k):
        return jax.random.uniform(k, (h_dim, h_dim), jnp.float32, -s, s)

    def b(k):
        return jax.random.uniform(k, (h_dim,), jnp.float32, -s, s)

    return {
        "wq": w(ks[0]), "bq": b(ks[1]),
        "wk": w(ks[2]), "bk": b(ks[3]),
        "wv": w(ks[4]), "bv": b(ks[5]),
        "wo": w(ks[6]), "bo": b(ks[7]),
    }


def reference(x, params, num_heads, compute_dtype=jnp.float32):
    """Plain-JAX reference mirroring the PyTorch forward (dropout = identity).

    compute_dtype sets the matmul-operand precision: float32 reproduces the
    exact module math; bfloat16 mirrors the kernel's bf16-on-MXU strategy.
    """
    B, T, C = x.shape
    H, D = num_heads, C // num_heads
    cd, f32 = compute_dtype, jnp.float32

    def proj(w, b):
        y = jnp.dot(x.astype(cd).reshape(B * T, C), w.astype(cd),
                    preferred_element_type=f32) + b
        return y.reshape(B, T, H, D).transpose(0, 2, 1, 3)       # (B, H, T, D)

    q = proj(params["wq"], params["bq"]) / jnp.sqrt(f32(D))
    k = proj(params["wk"], params["bk"])
    v = proj(params["wv"], params["bv"])

    logits = jnp.einsum("bhqd,bhkd->bhqk", q.astype(cd), k.astype(cd),
                        preferred_element_type=f32)
    mask = jnp.triu(jnp.ones((T, T), bool), k=1)
    logits = jnp.where(mask, -jnp.inf, logits)
    attn = jax.nn.softmax(logits, axis=-1)
    out = jnp.einsum("bhqk,bhkd->bhqd", attn.astype(cd), v.astype(cd),
                     preferred_element_type=f32)
    out = out.transpose(0, 2, 1, 3).reshape(B * T, C)
    y = jnp.dot(out.astype(cd), params["wo"].astype(cd),
                preferred_element_type=f32) + params["bo"]
    return y.reshape(B, T, C)


if __name__ == "__main__":
    # h_dim=32, seq_len=8, num_heads=4.  Demo shapes are deliberately tiny;
    # production use wants T, C multiples of 128 for lane-dense stores.
    B, T, C, NUM_HEADS = 4, 8, 32, 4
    key = jax.random.PRNGKey(0)
    kx, kp = jax.random.split(key)
    x = jax.random.normal(kx, (B, T, C), jnp.float32)
    params = init_params(kp, C)

    y_ref_bf16 = reference(x, params, NUM_HEADS, compute_dtype=jnp.bfloat16)
    y_ref_f32 = reference(x, params, NUM_HEADS, compute_dtype=jnp.float32)

    # Default (auto batch_block -> whole batch in one block at this size).
    y = jax.block_until_ready(masked_self_attention(x, params, NUM_HEADS))
    assert y.shape == (B, T, C)
    assert jnp.allclose(y, y_ref_bf16, atol=2e-2, rtol=2e-2), \
        "mismatch vs bf16-matched reference (auto batch_block)"
    assert jnp.allclose(y, y_ref_f32, atol=1e-1, rtol=1e-1), \
        "mismatch vs f32 reference (auto batch_block)"

    # Explicit batch_block=2: exercises multiple batch blocks with the resident
    # per-block output accumulation across the head axis.
    y2 = jax.block_until_ready(
        masked_self_attention(x, params, NUM_HEADS, batch_block=2))
    assert y2.shape == (B, T, C)
    assert jnp.allclose(y2, y_ref_bf16, atol=2e-2, rtol=2e-2), \
        "mismatch vs bf16-matched reference (batch_block=2)"
    assert jnp.allclose(y2, y_ref_f32, atol=1e-1, rtol=1e-1), \
        "mismatch vs f32 reference (batch_block=2)"

    print("KERNEL_OK")
</pallas_src>

<mosaic_0001>
module attributes {stable_mosaic.version = 11 : i64} {
  func.func @_mha_head_kernel(%arg0: i32, %arg1: i32, %arg2: memref<4x8x32xbf16, #tpu.memory_space<vmem>>, %arg3: memref<4x32x24xbf16, #tpu.memory_space<vmem>>, %arg4: memref<4x1x24xf32, #tpu.memory_space<vmem>>, %arg5: memref<4x8x32xbf16, #tpu.memory_space<vmem>>, %arg6: memref<1x32xf32, #tpu.memory_space<vmem>>, %arg7: memref<4x8x32xf32, #tpu.memory_space<vmem>>) attributes {dimension_semantics = [#tpu.dimension_semantics<parallel>, #tpu.dimension_semantics<arbitrary>], iteration_bounds = array<i64: 1, 4>, scalar_prefetch = 0 : i64, scratch_operands = 0 : i64, tpu.core_type = #tpu.core_type<tc>, window_params = [{transform_indices = @transform_0, window_bounds = array<i64: 4, 8, 32>}, {pipeline_mode = #tpu.pipeline_mode<synchronous>, transform_indices = @transform_1, window_bounds = array<i64: 4, 32, 24>}, {pipeline_mode = #tpu.pipeline_mode<synchronous>, transform_indices = @transform_2, window_bounds = array<i64: 4, 1, 24>}, {pipeline_mode = #tpu.pipeline_mode<synchronous>, transform_indices = @transform_3, window_bounds = array<i64: 4, 8, 32>}, {pipeline_mode = #tpu.pipeline_mode<synchronous>, transform_indices = @transform_4, window_bounds = array<i64: 1, 32>}, {transform_indices = @transform_5, window_bounds = array<i64: 4, 8, 32>}]} {
    %cst = arith.constant 8.000000e+00 : f32
    %0 = math.sqrt %cst : f32
    %cst_0 = arith.constant 1.000000e+00 : f32
    %1 = arith.divf %cst_0, %0 : f32
    %c0 = arith.constant 0 : index
    %c0_1 = arith.constant 0 : index
    %c0_2 = arith.constant 0 : index
    %2 = vector.load %arg2[%c0, %c0_1, %c0_2] : memref<4x8x32xbf16, #tpu.memory_space<vmem>>, vector<4x8x32xbf16>
    %3 = vector.shape_cast %2 : vector<4x8x32xbf16> to vector<32x32xbf16>
    %4 = arith.index_cast %arg1 : i32 to index
    %c0_3 = arith.constant 0 : index
    %c0_4 = arith.constant 0 : index
    %5 = vector.load %arg3[%4, %c0_3, %c0_4] : memref<4x32x24xbf16, #tpu.memory_space<vmem>>, vector<1x32x24xbf16>
    %6 = vector.shape_cast %5 : vector<1x32x24xbf16> to vector<32x24xbf16>
    %cst_5 = arith.constant dense<0.000000e+00> : vector<32x24xf32>
    %7 = tpu.matmul %3, %6, %cst_5 {dimension_numbers = #tpu.dot_dimension_numbers<[1], [0], [0], [1], [0, 0, 1, 1], [], []>} : vector<32x32xbf16>, vector<32x24xbf16>, vector<32x24xf32> -> vector<32x24xf32>
    %8 = arith.index_cast %arg1 : i32 to index
    %c0_6 = arith.constant 0 : index
    %c0_7 = arith.constant 0 : index
    %9 = vector.load %arg4[%8, %c0_6, %c0_7] : memref<4x1x24xf32, #tpu.memory_space<vmem>>, vector<1x1x24xf32>
    %10 = vector.shape_cast %9 : vector<1x1x24xf32> to vector<1x24xf32>
    %11 = vector.broadcast %10 : vector<1x24xf32> to vector<32x24xf32>
    %12 = arith.addf %7, %11 : vector<32x24xf32>
    %13 = vector.extract_strided_slice %12 {offsets = [0, 0], sizes = [32, 8], strides = [1, 1]} : vector<32x24xf32> to vector<32x8xf32>
    %14 = vector.broadcast %1 : f32 to vector<32x8xf32>
    %15 = arith.mulf %13, %14 : vector<32x8xf32>
    %16 = vector.shape_cast %15 : vector<32x8xf32> to vector<4x8x8xf32>
    %17 = arith.truncf %16 : vector<4x8x8xf32> to vector<4x8x8xbf16>
    %18 = vector.extract_strided_slice %12 {offsets = [0, 8], sizes = [32, 8], strides = [1, 1]} : vector<32x24xf32> to vector<32x8xf32>
    %19 = vector.shape_cast %18 : vector<32x8xf32> to vector<4x8x8xf32>
    %20 = arith.truncf %19 : vector<4x8x8xf32> to vector<4x8x8xbf16>
    %21 = vector.extract_strided_slice %12 {offsets = [0, 16], sizes = [32, 8], strides = [1, 1]} : vector<32x24xf32> to vector<32x8xf32>
    %22 = vector.shape_cast %21 : vector<32x8xf32> to vector<4x8x8xf32>
    %23 = arith.truncf %22 : vector<4x8x8xf32> to vector<4x8x8xbf16>
    "tpu.trace_start"() <{level = 10 : i32, message = "bqd,bkd->bqk"}> : () -> ()
    %cst_8 = arith.constant dense<0.000000e+00> : vector<4x8x8xf32>
    %24 = tpu.matmul %17, %20, %cst_8 {dimension_numbers = #tpu.dot_dimension_numbers<[2], [2], [1], [1], [0, 0, 0, 1, 1, 1], [0], [0]>} : vector<4x8x8xbf16>, vector<4x8x8xbf16>, vector<4x8x8xf32> -> vector<4x8x8xf32>
    "tpu.trace_stop"() : () -> ()
    %25 = tpu.iota {dimensions = array<i32: 0>} : vector<8x8xi32>
    %26 = tpu.iota {dimensions = array<i32: 1>} : vector<8x8xi32>
    %27 = arith.cmpi sgt, %26, %25 : vector<8x8xi32>
    %cst_9 = arith.constant -1.000000e+30 : f32
    %28 = vector.shape_cast %27 : vector<8x8xi1> to vector<1x8x8xi1>
    %29 = vector.broadcast %28 : vector<1x8x8xi1> to vector<4x8x8xi1>
    %30 = vector.broadcast %cst_9 : f32 to vector<4x8x8xf32>
    %31 = arith.select %29, %30, %24 : vector<4x8x8xi1>, vector<4x8x8xf32>
    %cst_10 = arith.constant dense<0xFF800000> : vector<4x8xf32>
    %32 = vector.multi_reduction <maximumf>, %31, %cst_10 [2] : vector<4x8x8xf32> to vector<4x8xf32>
    %33 = vector.shape_cast %32 : vector<4x8xf32> to vector<4x8x1xf32>
    %34 = vector.broadcast %33 : vector<4x8x1xf32> to vector<4x8x8xf32>
    %35 = arith.subf %31, %34 : vector<4x8x8xf32>
    %36 = math.exp %35 : vector<4x8x8xf32>
    %cst_11 = arith.constant dense<0.000000e+00> : vector<4x8xf32>
    %37 = vector.multi_reduction <add>, %36, %cst_11 [2] : vector<4x8x8xf32> to vector<4x8xf32>
    %38 = vector.shape_cast %37 : vector<4x8xf32> to vector<4x8x1xf32>
    %39 = tpu.reciprocal %38 {approx = true} : vector<4x8x1xf32> -> vector<4x8x1xf32>
    %40 = vector.broadcast %39 : vector<4x8x1xf32> to vector<4x8x8xf32>
    %41 = arith.mulf %36, %40 : vector<4x8x8xf32>
    %42 = arith.truncf %41 : vector<4x8x8xf32> to vector<4x8x8xbf16>
    "tpu.trace_start"() <{level = 10 : i32, message = "bqk,bkd->bqd"}> : () -> ()
    %cst_12 = arith.constant dense<0.000000e+00> : vector<4x8x8xf32>
    %43 = tpu.matmul %42, %23, %cst_12 {dimension_numbers = #tpu.dot_dimension_numbers<[2], [1], [1], [2], [0, 0, 0, 1, 1, 2], [0], [0]>} : vector<4x8x8xbf16>, vector<4x8x8xbf16>, vector<4x8x8xf32> -> vector<4x8x8xf32>
    "tpu.trace_stop"() : () -> ()
    %44 = vector.shape_cast %43 : vector<4x8x8xf32> to vector<32x8xf32>
    %45 = arith.truncf %44 : vector<32x8xf32> to vector<32x8xbf16>
    %46 = arith.index_cast %arg1 : i32 to index
    %c0_13 = arith.constant 0 : index
    %c0_14 = arith.constant 0 : index
    %47 = vector.load %arg5[%46, %c0_13, %c0_14] : memref<4x8x32xbf16, #tpu.memory_space<vmem>>, vector<1x8x32xbf16>
    %48 = vector.shape_cast %47 : vector<1x8x32xbf16> to vector<8x32xbf16>
    %cst_15 = arith.constant dense<0.000000e+00> : vector<32x32xf32>
    %49 = tpu.matmul %45, %48, %cst_15 {dimension_numbers = #tpu.dot_dimension_numbers<[1], [0], [0], [1], [0, 0, 1, 1], [], []>} : vector<32x8xbf16>, vector<8x32xbf16>, vector<32x32xf32> -> vector<32x32xf32>
    %50 = vector.shape_cast %49 : vector<32x32xf32> to vector<4x8x32xf32>
    %c0_i32 = arith.constant 0 : i32
    %51 = arith.cmpi eq, %arg1, %c0_i32 : i32
    %52 = arith.extui %51 : i1 to i32
    %c0_i32_16 = arith.constant 0 : i32
    %53 = arith.cmpi ne, %52, %c0_i32_16 : i32
    scf.if %53 {
      %c0_20 = arith.constant 0 : index
      %c0_21 = arith.constant 0 : index
      %c0_22 = arith.constant 0 : index
      %60 = vector.load %arg7[%c0_20, %c0_21, %c0_22] : memref<4x8x32xf32, #tpu.memory_space<vmem>>, vector<4x8x32xf32>
      tpu.vector_store %arg7[%c0_20, %c0_21, %c0_22], %50 {strides = array<i32>} : memref<4x8x32xf32, #tpu.memory_space<vmem>>, vector<4x8x32xf32>,
    } else {
    }
    %c0_i32_17 = arith.constant 0 : i32
    %54 = arith.cmpi sgt, %arg1, %c0_i32_17 : i32
    %55 = arith.extui %54 : i1 to i32
    %c0_i32_18 = arith.constant 0 : i32
    %56 = arith.cmpi ne, %55, %c0_i32_18 : i32
    scf.if %56 {
      %c0_20 = arith.constant 0 : index
      %c0_21 = arith.constant 0 : index
      %c0_22 = arith.constant 0 : index
      %60 = vector.load %arg7[%c0_20, %c0_21, %c0_22] : memref<4x8x32xf32, #tpu.memory_space<vmem>>, vector<4x8x32xf32>
      %61 = arith.addf %60, %50 : vector<4x8x32xf32>
      %c0_23 = arith.constant 0 : index
      %c0_24 = arith.constant 0 : index
      %c0_25 = arith.constant 0 : index
      %62 = vector.load %arg7[%c0_23, %c0_24, %c0_25] : memref<4x8x32xf32, #tpu.memory_space<vmem>>, vector<4x8x32xf32>
      tpu.vector_store %arg7[%c0_23, %c0_24, %c0_25], %61 {strides = array<i32>} : memref<4x8x32xf32, #tpu.memory_space<vmem>>, vector<4x8x32xf32>,
    } else {
    }
    %c3_i32 = arith.constant 3 : i32
    %57 = arith.cmpi eq, %arg1, %c3_i32 : i32
    %58 = arith.extui %57 : i1 to i32
    %c0_i32_19 = arith.constant 0 : i32
    %59 = arith.cmpi ne, %58, %c0_i32_19 : i32
    scf.if %59 {
      %c0_20 = arith.constant 0 : index
      %c0_21 = arith.constant 0 : index
      %c0_22 = arith.constant 0 : index
      %60 = vector.load %arg7[%c0_20, %c0_21, %c0_22] : memref<4x8x32xf32, #tpu.memory_space<vmem>>, vector<4x8x32xf32>
      %c0_23 = arith.constant 0 : index
      %c0_24 = arith.constant 0 : index
      %61 = vector.load %arg6[%c0_23, %c0_24] : memref<1x32xf32, #tpu.memory_space<vmem>>, vector<1x32xf32>
      %62 = vector.shape_cast %61 : vector<1x32xf32> to vector<1x1x32xf32>
      %63 = vector.broadcast %62 : vector<1x1x32xf32> to vector<4x8x32xf32>
      %64 = arith.addf %60, %63 : vector<4x8x32xf32>
      %c0_25 = arith.constant 0 : index
      %c0_26 = arith.constant 0 : index
      %c0_27 = arith.constant 0 : index
      %65 = vector.load %arg7[%c0_25, %c0_26, %c0_27] : memref<4x8x32xf32, #tpu.memory_space<vmem>>, vector<4x8x32xf32>
      tpu.vector_store %arg7[%c0_25, %c0_26, %c0_27], %64 {strides = array<i32>} : memref<4x8x32xf32, #tpu.memory_space<vmem>>, vector<4x8x32xf32>,
    } else {
    }
    return
  }
  func.func @transform_0(%arg0: i32, %arg1: i32) -> (i32, i32, i32) {
    %c0_i32 = arith.constant 0 : i32
    %c0_i32_0 = arith.constant 0 : i32
    %c0_i32_1 = arith.constant 0 : i32
    return %arg0, %c0_i32, %c0_i32_0 : i32, i32, i32
  }
  func.func @transform_1(%arg0: i32, %arg1: i32) -> (i32, i32, i32) {
    %c0_i32 = arith.constant 0 : i32
    %c0_i32_0 = arith.constant 0 : i32
    %c0_i32_1 = arith.constant 0 : i32
    %c0_i32_2 = arith.constant 0 : i32
    return %c0_i32, %c0_i32_0, %c0_i32_1 : i32, i32, i32
  }
  func.func @transform_2(%arg0: i32, %arg1: i32) -> (i32, i32, i32) {
    %c0_i32 = arith.constant 0 : i32
    %c0_i32_0 = arith.constant 0 : i32
    %c0_i32_1 = arith.constant 0 : i32
    %c0_i32_2 = arith.constant 0 : i32
    return %c0_i32, %c0_i32_0, %c0_i32_1 : i32, i32, i32
  }
  func.func @transform_3(%arg0: i32, %arg1: i32) -> (i32, i32, i32) {
    %c0_i32 = arith.constant 0 : i32
    %c0_i32_0 = arith.constant 0 : i32
    %c0_i32_1 = arith.constant 0 : i32
    %c0_i32_2 = arith.constant 0 : i32
    return %c0_i32, %c0_i32_0, %c0_i32_1 : i32, i32, i32
  }
  func.func @transform_4(%arg0: i32, %arg1: i32) -> (i32, i32) {
    %c0_i32 = arith.constant 0 : i32
    %c0_i32_0 = arith.constant 0 : i32
    %c0_i32_1 = arith.constant 0 : i32
    return %c0_i32, %c0_i32_0 : i32, i32
  }
  func.func @transform_5(%arg0: i32, %arg1: i32) -> (i32, i32, i32) {
    %c0_i32 = arith.constant 0 : i32
    %c0_i32_0 = arith.constant 0 : i32
    %c0_i32_1 = arith.constant 0 : i32
    return %arg0, %c0_i32, %c0_i32_0 : i32, i32, i32
  }
}

</mosaic_0001>

<bundles_post_ra>
// kernel: tpu_custom_call.1
= control target key start
LH: loop header
LB: loop body
LE: loop exit
PB: predicated region body
PF: predicated region fallthrough
CT: control target
= control target key end

     0   :  { %10 = vsyncpa [#allocation3], 0  ;;  %s1237_s18 = smov 0   ;;  %s1239_s19 = smov 0   ;;  %s1409_s0 = inlined_call_operand.vmem [shape: bf16[4,8,32], index: 0, kind: input, shape index: {}]   ;;  %s1410_s1 = inlined_call_operand.vmem [shape: bf16[4,32,24], index: 1, kind: input, shape index: {}]   ;;  %s1411_s2 = inlined_call_operand.vmem [shape: f32[4,1,24], index: 2, kind: input, shape index: {}]   ;;  %s1412_s3 = inlined_call_operand.vmem [shape: bf16[4,8,32], index: 3, kind: input, shape index: {}]   ;;  %s1413_s4 = inlined_call_operand.vmem [shape: f32[1,32], index: 4, kind: input, shape index: {}]   ;;  %s1414_s5 = inlined_call_operand.hbm [shape: f32[4,8,32], index: 5, kind: output, shape index: {}]  }
   0x1   :  { %s1241_s20 = smov 0  }
   0x2 LB: > { %s970_s21 = sadd.s32 4294967295, %s1198_s20   ;;  %s25_s22 = sadd.s32 1, %s1194_s19  ;;  %s1198_s20 = sphi %s1241_s20, %s16_s20   ;;  %s1194_s19 = sphi %s1239_s19, %s1417_s19   ;;  %s1190_s18 = sphi %s1237_s18, %s1416_s18  }
   0x3   : > { %p26_p0 = scmp.ge.s32.totalorder %s25_s22, 4  ;;  %p973_p1 = scmp.ge.s32.totalorder %s1198_s20, 1 }
   0x4   : > { %p201_p2 = scmp.lt.s32.totalorder %s1198_s20, 5 }
   0x5   : > { %s1419_s22 = smov (%p26_p0, %s25_s22), 0 }
   0x6   : > { %p202_p3 = pnand %p973_p1, %p201_p2 }
   0x7   : > { %s1002_s23 = sshll.u32 (!%p202_p3), %s1190_s18, 4  ;;  %v1128_v0 = vld [vmem:[%s1409_s0] sm:$0xff] (!%p202_p3)   ;;  %vm273_vm0 = vcmask (!%p202_p3), 261120   ;;  %v1129_v3 = vld [vmem:[%s1409_s0 + $0x8] sm:$0xff] (!%p202_p3)   ;;  %v1200_v4 = vmov (!%p202_p3), 0.0   ;;  %s243_s8 = scalar_lea.vmem (!%p202_p3), %s1411_s2, %s1190_s18  ;;  %vm1201_vm1 = vmmov (!%p202_p3), 0   ;;  %v538_v34 = vlaneseq (!%p202_p3) }
   0x8   : > { %205 = sbr.rel (%p202_p3) target bundleno = 1377 (0x561), region = 40  ;;  %s238_s28 = scalar_lea.vmem (!%p202_p3), %s1410_s1, %s1002_s23  ;;  %1030 = vmatprep.mubr.msk.bf16.mxu0 (!%p202_p3), %vm273_vm0, %v1128_v0  ;;  %1034 = vmatprep.subr.bf16.mxu1 (!%p202_p3), %v1200_v4  ;;  %v976_v5 = vld [vmem:[%s243_s8] ss:$0 sm:$0xff] (!%p202_p3)  ;;  %vm344_vm2 = vcmask (!%p202_p3), 64512   ;;  %vm602_vm4 = vcmask (!%p202_p3), 1043456  }
   0x9   : > { %v1126_v1 = vld [vmem:[%s238_s28] sm:$0xff] (!%p202_p3)   ;;  %v1127_v2 = vld [vmem:[%s238_s28 + $0x8] sm:$0xff] (!%p202_p3)   ;;  %1036 = vmatprep.mubr.msk.bf16.mxu1 (!%p202_p3), %vm1201_vm1, %v1200_v4  ;;  %s1202_s9 = smov (!%p202_p3), 120   ;;  %v539_v35 = vshrl.u32 (!%p202_p3), %v538_v34, 7  ;;  %v541_v36 = vand.u32 (!%p202_p3), 127, %v538_v34  ;;  %s1203_s10 = smov (!%p202_p3), 112  }
   0xa   : > { %1026 = vmatprep.subr.bf16.mxu0 (!%p202_p3), %v1126_v1  ;;  %s991_s11 = sshll.u32 (!%p202_p3), %s1190_s18, 2  ;;  %p994_p4 = scmp.ne.s32.totalorder (!%p202_p3), %s1190_s18, 0 }
   0xb   : > { %1027 = vmatpush3.bf16.msra.mxu0 (!%p202_p3), %v1126_v1  ;;  %vm542_vm3 = vcmp.gt.s32.totalorder (!%p202_p3), %v541_v36, %v539_v35  ;;  %s793_s14 = scalar_lea.vmem (!%p202_p3), %s1412_s3, %s991_s11 }
   0xc   : > { %1028 = vmatprep.subr.bf16.mxu0 (!%p202_p3), %v1127_v2 }
   0xf   : > { %1029 = vmatpush3.bf16.msra.mxu0 %v1127_v2 }
  0x10   : > { %1040 = vmatprep.subr.bf16.mxu0 %v1200_v4 }
  0x12   : > { %1031 = vmatmul.mubr.msk.bf16.vlgmr.msra.gmra.mrb[0].mxu0 %vm273_vm0, %v1129_v3 }
  0x13   : > { %1042 = vmatprep.mubr.msk.bf16.mxu0 %vm1201_vm1, %v1200_v4 }
  0xe5   : > { %v1032_v6 = vpop.f32.mrb[0].mxu0 }
  0xe6   : > { %v323_v7 = vadd.f32 %v1032_v6, %v976_v5  ;;  %v314_v8 = vpop.f32.mrb[1].mxu0 }
  0xe7   : > { %v315_v9 = vadd.f32 %v976_v5, %v314_v8  ;;  %v1033_v10 = vpop.f32.mrb[2].mxu0 }
  0xe8   : > { %v326_v11 = vadd.f32 %v1033_v10, %v976_v5  ;;  %v317_v12 = vpop.f32.mrb[3].mxu0  ;;  %v1280_v13 = vpack.c.bf16 %v323_v7, %v323_v7  ;;  %v331_v28 = vmul.f32 0.35355338, %v323_v7 }
  0xe9   : > { %v318_v14 = vadd.f32 %v976_v5, %v317_v12  ;;  %v1282_v15 = vpack.c.bf16 %v315_v9, %v315_v9  ;;  %v329_v20 = vmul.f32 0.35355338, %v315_v9 }
  0xea   : > { %441 = vrot.lane.b32.xlu1 %v1280_v13, %s1202_s9  ;;  %v1286_v16 = vpack.c.bf16 %v326_v11, %v326_v11  ;;  %v335_v31 = vpack.c.bf16 %v331_v28, %v331_v28  ;;  %v332_v32 = vmul.f32 0.35355338, %v326_v11 }
  0xeb   : > { %342 = vrot.lane.b32.xlu0 %v1282_v15, %s1202_s9  ;;  %v1288_v17 = vpack.c.bf16 %v318_v14, %v318_v14  ;;  %v333_v24 = vpack.c.bf16 %v329_v20, %v329_v20  ;;  %v330_v25 = vmul.f32 0.35355338, %v318_v14 }
  0xec   : > { %v336_v33 = vpack.c.bf16 %v332_v32, %v332_v32 }
  0xed   : > { %v334_v29 = vpack.c.bf16 %v330_v25, %v330_v25 }
  0xee   : > { %490 = vrot.lane.b32.xlu1 %v1286_v16, %s1202_s9 }
  0xef   : > { %392 = vrot.lane.b32.xlu0 %v1288_v17, %s1202_s9 }
 0x15c   : > { %v442_v21 = vpop.permute.xlu1 %441 }
 0x15d   : > { %v343_v18 = vpop.permute.xlu0 %342  ;;  %v447_v26 = vsel %vm344_vm2, %v442_v21, 0 }
 0x15e   : > { %v349_v19 = vsel %vm344_vm2, %v343_v18, 0 }
 0x15f   : > { %1035 = vmatpush3.bf16.xpose.msra.mxu1 %v349_v19 }
 0x160   : > { %1046 = vmatprep.subr.bf16.mxu1 %v1200_v4  ;;  %v491_v27 = vpop.permute.xlu1 %490 }
 0x161   : > { %v393_v22 = vpop.permute.xlu0 %392  ;;  %v496_v30 = vsel %vm344_vm2, %v491_v27, 0 }
 0x162   : > { %v398_v23 = vsel %vm344_vm2, %v393_v22, 0 }
 0x163   : > { %1041 = vmatpush3.bf16.xpose.msra.mxu0 %v398_v23 }
 0x164   : > { %1052 = vmatprep.subr.bf16.mxu0 %v1200_v4 }
 0x166   : > { %1037 = vmatmul.mubr.msk.bf16.vlgmr.msra.gmra.mrb[0].mxu1 %vm344_vm2, %v333_v24 }
 0x167   : > { %1047 = vmatpush3.bf16.xpose.msra.mxu1 %v447_v26  ;;  %1048 = vmatprep.mubr.msk.bf16.mxu1 %vm1201_vm1, %v1200_v4 }
 0x168   : > { %1058 = vmatprep.subr.bf16.mxu1 %v1200_v4 }
 0x16a   : > { %1043 = vmatmul.mubr.msk.bf16.vlgmr.msra.gmra.mrb[4].mxu0 %vm344_vm2, %v334_v29 }
 0x16b   : > { %1053 = vmatpush3.bf16.xpose.msra.mxu0 %v496_v30  ;;  %1054 = vmatprep.mubr.msk.bf16.mxu0 %vm1201_vm1, %v1200_v4 }
 0x16c   : > { %1064 = vmatprep.subr.bf16.mxu0 %v1200_v4 }
 0x16e   : > { %1049 = vmatmul.mubr.msk.bf16.vlgmr.msra.gmra.mrb[4].mxu1 %vm344_vm2, %v335_v31 }
 0x16f   : > { %1060 = vmatprep.mubr.msk.bf16.mxu1 %vm1201_vm1, %v1200_v4 }
 0x172   : > { %1055 = vmatmul.mubr.msk.bf16.vlgmr.msra.gmra.mrb[8].mxu0 %vm344_vm2, %v336_v33 }
 0x173   : > { %1066 = vmatprep.mubr.msk.bf16.mxu0 %vm1201_vm1, %v1200_v4 }
 0x239   : > { %v385_v37 = vpop.f32.mrb[0].mxu1 }
 0x23a   : > { %v545_v38 = vsel %vm542_vm3, -1e+30, %v385_v37  ;;  %v1038_v39 = vpop.f32.mrb[1].mxu1 }
 0x23b   : > { %v388_v40 = vpop.f32.mrb[2].mxu1  ;;  %v549_v41 = vsel %vm344_vm2, %v545_v38, -inf }
 0x23c   : > { %550 = vmax.xlane.f32.xlu0 %v549_v41  ;;  %v1039_v42 = vpop.f32.mrb[3].mxu1 }
 0x23d   : > { %v434_v43 = vpop.f32.mrb[4].mxu0  ;;  %v794_v42 = vld [vmem:[%s793_s14] sm:$0xf] }
 0x23e   : > { %v546_v44 = vsel %vm542_vm3, -1e+30, %v434_v43  ;;  %v1044_v45 = vpop.f32.mrb[5].mxu0  ;;  %v802_v43 = vsel %vm602_vm4, %v794_v42, 0 }
 0x23f   : > { %v437_v46 = vpop.f32.mrb[6].mxu0  ;;  %v552_v47 = vsel %vm344_vm2, %v546_v44, -inf }
 0x240   : > { %553 = vmax.xlane.f32.xlu1 %v552_v47  ;;  %v1045_v48 = vpop.f32.mrb[7].mxu0 }
 0x241   : > { %v483_v49 = vpop.f32.mrb[4].mxu1 }
 0x242   : > { %v547_v50 = vsel %vm542_vm3, -1e+30, %v483_v49  ;;  %v1050_v51 = vpop.f32.mrb[5].mxu1 }
 0x243   : > { %v486_v52 = vpop.f32.mrb[6].mxu1  ;;  %v555_v53 = vsel %vm344_vm2, %v547_v50, -inf }
 0x244   : > { %556 = vmax.xlane.f32.xlu0 %v555_v53  ;;  %v1051_v54 = vpop.f32.mrb[7].mxu1 }
 0x245   : > { %v532_v55 = vpop.f32.mrb[8].mxu0 }
 0x246   : > { %v548_v56 = vsel %vm542_vm3, -1e+30, %v532_v55  ;;  %v1056_v57 = vpop.f32.mrb[9].mxu0 }
 0x247   : > { %v535_v58 = vpop.f32.mrb[10].mxu0  ;;  %v558_v59 = vsel %vm344_vm2, %v548_v56, -inf }
 0x248   : > { %v1057_v60 = vpop.f32.mrb[11].mxu0  ;;  %559 = vmax.xlane.f32.xlu0 %v558_v59 }
 0x251   : > { %597 = vrot.lane.b32.xlu1 %v1282_v15, %s1203_s10 }
 0x2c9   : > { %v551_v61 = vpop.xlane.xlu0 %550 }
 0x2ca   : > { %v561_v62 = vsub.f32 %v545_v38, %v551_v61 }
 0x2cc   : > { %v565_v63 = vmul.f32 1.442695, %v561_v62 }
 0x2cd   : > { %v554_v0 = vpop.xlane.xlu1 %553 }
 0x2ce   : > { %1130 = vpow2.f32 %v565_v63  ;;  %v562_v1 = vsub.f32 %v546_v44, %v554_v0 }
 0x2d0   : > { %v567_v2 = vmul.f32 1.442695, %v562_v1 }
 0x2d1   : > { %v598_v3 = vpop.permute.xlu1 %597  ;;  %v557_v5 = vpop.xlane.xlu0 %556 }
 0x2d2   : > { %1132 = vpow2.f32 %v567_v2  ;;  %v604_v6 = vsel %vm602_vm4, %v598_v3, 0  ;;  %v563_v7 = vsub.f32 %v547_v50, %v557_v5 }
 0x2d3   : > { %1059 = vmatpush3.bf16.msra.mxu1 %v604_v6 }
 0x2d4   : > { %v569_v8 = vmul.f32 1.442695, %v563_v7  ;;  %1070 = vmatprep.subr.bf16.mxu1 %v1200_v4 }
 0x2d5   : > { %v560_v9 = vpop.xlane.xlu0 %559 }
 0x2d6   : > { %1134 = vpow2.f32 %v569_v8  ;;  %v564_v10 = vsub.f32 %v548_v56, %v560_v9 }
 0x2d8   : > { %v1131_v11 = vpop.eup %1130  ;;  %v571_v12 = vmul.f32 1.442695, %v564_v10 }
 0x2d9   : > { %v573_v14 = vsel %vm344_vm2, %v1131_v11, 0.0 }
 0x2da   : > { %1136 = vpow2.f32 %v571_v12  ;;  %574 = vadd.xlane.f32.xlu1 %v573_v14 }
 0x2dc   : > { %v1133_v15 = vpop.eup %1132 }
 0x2dd   : > { %v576_v18 = vsel %vm344_vm2, %v1133_v15, 0.0 }
 0x2de   : > { %577 = vadd.xlane.f32.xlu0 %v576_v18 }
 0x2e0   : > { %v1135_v19 = vpop.eup %1134 }
 0x2e1   : > { %v579_v20 = vsel %vm344_vm2, %v1135_v19, 0.0 }
 0x2e2   : > { %580 = vadd.xlane.f32.xlu1 %v579_v20 }
 0x2e4   : > { %v1137_v21 = vpop.eup %1136 }
 0x2e5   : > { %v582_v22 = vsel %vm344_vm2, %v1137_v21, 0.0 }
 0x2e6   : > { %583 = vadd.xlane.f32.xlu0 %v582_v22 }
 0x2f3   : > { %694 = vrot.lane.b32.xlu1 %v1280_v13, %s1203_s10 }
 0x2f7   : > { %742 = vrot.lane.b32.xlu1 %v1286_v16, %s1203_s10 }
 0x2fc   : > { %646 = vrot.lane.b32.xlu0 %v1288_v17, %s1203_s10 }
 0x367   : > { %v575_v23 = vpop.xlane.xlu1 %574 }
 0x368   : > { %1138 = vrcp.f32 %v575_v23 }
 0x36b   : > { %v578_v24 = vpop.xlane.xlu0 %577 }
 0x36c   : > { %1140 = vrcp.f32 %v578_v24 }
 0x36f   : > { %v581_v25 = vpop.xlane.xlu1 %580 }
 0x370   : > { %1142 = vrcp.f32 %v581_v25 }
 0x372   : > { %v1139_v26 = vpop.eup %1138 }
 0x373   : > { %v589_v27 = vmul.f32 %v1139_v26, %v1131_v11  ;;  %v695_v28 = vpop.permute.xlu1 %694  ;;  %v584_v29 = vpop.xlane.xlu0 %583 }
 0x374   : > { %1144 = vrcp.f32 %v584_v29  ;;  %v700_v32 = vsel %vm602_vm4, %v695_v28, 0 }
 0x375   : > { %v593_v30 = vpack.c.bf16 %v589_v27, %v589_v27 }
 0x376   : > { %v1141_v31 = vpop.eup %1140 }
 0x377   : > { %v590_v13 = vmul.f32 %v1141_v31, %v1133_v15  ;;  %1061 = vmatmul.mubr.msk.bf16.vlgmr.msra.gmra.mrb[8].mxu1 %vm344_vm2, %v593_v30  ;;  %v647_v16 = vpop.permute.xlu0 %646  ;;  %v743_v33 = vpop.permute.xlu1 %742 }
 0x378   : > { %1071 = vmatpush3.bf16.msra.mxu1 %v700_v32  ;;  %v652_v17 = vsel %vm602_vm4, %v647_v16, 0  ;;  %1072 = vmatprep.mubr.msk.bf16.mxu1 %vm1201_vm1, %v1200_v4  ;;  %v748_v37 = vsel %vm602_vm4, %v743_v33, 0 }
 0x379   : > { %1065 = vmatpush3.bf16.msra.mxu0 %v652_v17  ;;  %v594_v34 = vpack.c.bf16 %v590_v13, %v590_v13  ;;  %1088 = vmatprep.subr.msk.bf16.mxu1 %vm602_vm4, %v794_v42 }
 0x37a   : > { %v1143_v35 = vpop.eup %1142  ;;  %1076 = vmatprep.subr.bf16.mxu0 %v1200_v4 }
 0x37b   : > { %v591_v36 = vmul.f32 %v1143_v35, %v1135_v19 }
 0x37c   : > { %1067 = vmatmul.mubr.msk.bf16.vlgmr.msra.gmra.mrb[12].mxu0 %vm344_vm2, %v594_v34 }
 0x37d   : > { %1077 = vmatpush3.bf16.msra.mxu0 %v748_v37  ;;  %v595_v38 = vpack.c.bf16 %v591_v36, %v591_v36  ;;  %1078 = vmatprep.mubr.msk.bf16.mxu0 %vm1201_vm1, %v1200_v4 }
 0x37e   : > { %v1145_v39 = vpop.eup %1144 }
 0x37f   : > { %v592_v40 = vmul.f32 %v1145_v39, %v1137_v21  ;;  %1073 = vmatmul.mubr.msk.bf16.vlgmr.msra.gmra.mrb[12].mxu1 %vm344_vm2, %v595_v38 }
 0x380   : > { %1083 = vmatpush3.bf16.msra.mxu1 %v802_v43 }
 0x381   : > { %v596_v41 = vpack.c.bf16 %v592_v40, %v592_v40 }
 0x384   : > { %1079 = vmatmul.mubr.msk.bf16.vlgmr.msra.gmra.mrb[16].mxu0 %vm344_vm2, %v596_v41 }
 0x44a   : > { %v640_v44 = vpop.f32.mrb[8].mxu1 }
 0x44b   : > { %v1062_v4 = vpop.f32.mrb[9].mxu1 }
 0x44c   : > { %v643_v45 = vpop.f32.mrb[10].mxu1 }
 0x44d   : > { %v1063_v46 = vpop.f32.mrb[11].mxu1 }
 0x44f   : > { %v688_v47 = vpop.f32.mrb[12].mxu0 }
 0x450   : > { %v790_v48 = vpack.c.bf16 %v688_v47, %v640_v44  ;;  %v1068_v49 = vpop.f32.mrb[13].mxu0 }
 0x451   : > { %v691_v50 = vpop.f32.mrb[14].mxu0 }
 0x452   : > { %v1069_v51 = vpop.f32.mrb[15].mxu0  ;;  %v736_v52 = vpop.f32.mrb[12].mxu1  ;;  %1084 = vmatprep.mubr.msk.bf16.mxu1 %vm344_vm2, %v790_v48 }
 0x453   : > { %v1074_v53 = vpop.f32.mrb[13].mxu1 }
 0x454   : > { %v739_v54 = vpop.f32.mrb[14].mxu1 }
 0x455   : > { %v1075_v55 = vpop.f32.mrb[15].mxu1 }
 0x457   : > { %v784_v56 = vpop.f32.mrb[16].mxu0 }
 0x458   : > { %v791_v57 = vpack.c.bf16 %v784_v56, %v736_v52  ;;  %v1080_v58 = vpop.f32.mrb[17].mxu0 }
 0x459   : > { %v787_v59 = vpop.f32.mrb[18].mxu0 }
 0x45a   : > { %v1081_v60 = vpop.f32.mrb[19].mxu0  ;;  %1085 = vmatmul.mubr.msk.bf16.vlgmr.msra.gmra.mrb[16].mxu1 %vm344_vm2, %v791_v57 }
 0x52a   : > { %856 = sbr.rel (%p994_p4) target bundleno = 1330 (0x532), region = 44 }
 0x52d   : > { %v1086_v61 = vpop.f32.mrb[16].mxu1 }
 0x52e   : > { %v838_v62 = vpop.f32.mrb[17].mxu1  ;;  %859 = vst.msk [vmem:[#allocation2 + $0x10] sm:$0xff] (!%p994_p4), %vm273_vm0, %v1086_v61 }
 0x52f   : > { %v1087_v63 = vpop.f32.mrb[18].mxu1  ;;  %857 = vst.msk [vmem:[#allocation2] sm:$0xff] (!%p994_p4), %vm273_vm0, %v838_v62 }
 0x530   : > { %v841_v0 = vpop.f32.mrb[19].mxu1  ;;  %860 = vst.msk [vmem:[#allocation2 + $0x18] sm:$0xff] (!%p994_p4), %vm273_vm0, %v1087_v63 }
 0x531   : > { %858 = vst.msk [vmem:[#allocation2 + $0x8] sm:$0xff] %vm273_vm0, %v841_v0 }
 0x532 PF: > { %p995_p5 = scmp.le.s32.totalorder %s1190_s18, 0 }
 0x534   : > { %864 = sbr.rel (%p995_p5) target bundleno = 1340 (0x53c), region = 48 }
 0x536   : > { %v867_v3 = vld [vmem:[#allocation2 + $0x10] sm:$0xff] (!%p995_p5) }
 0x537   : > { %v865_v1 = vld [vmem:[#allocation2] sm:$0xff] (!%p995_p5)  ;;  %v871_v7 = vadd.f32 (!%p995_p5), %v1086_v61, %v867_v3 }
 0x538   : > { %v866_v2 = vld [vmem:[#allocation2 + $0x8] sm:$0xff] (!%p995_p5)  ;;  %v869_v5 = vadd.f32 (!%p995_p5), %v865_v1, %v838_v62  ;;  %v868_v8 = vld [vmem:[#allocation2 + $0x18] sm:$0xff] (!%p995_p5) }
 0x539   : > { %v870_v6 = vadd.f32 (!%p995_p5), %v866_v2, %v841_v0  ;;  %v872_v9 = vadd.f32 (!%p995_p5), %v1087_v63, %v868_v8  ;;  %875 = vst.msk [vmem:[#allocation2 + $0x10] sm:$0xff] (!%p995_p5), %vm273_vm0, %v871_v7 }
 0x53a   : > { %873 = vst.msk [vmem:[#allocation2] sm:$0xff] (!%p995_p5), %vm273_vm0, %v869_v5 }
 0x53b   : > { %874 = vst.msk [vmem:[#allocation2 + $0x8] sm:$0xff] %vm273_vm0, %v870_v6  ;;  %876 = vst.msk [vmem:[#allocation2 + $0x18] sm:$0xff] %vm273_vm0, %v872_v9 }
 0x53c PF: > { %p996_p6 = scmp.ne.s32.totalorder %s1190_s18, 3 }
 0x53d   : > { %v997_v11 = vld [vmem:[%s1413_s4] ss:$0 sm:$0xff] (!%p996_p6) }
 0x53e   : > { %880 = sbr.rel (%p996_p6) target bundleno = 1351 (0x547), region = 52 }
 0x541   : > { %v883_v18 = vld [vmem:[#allocation2 + $0x10] sm:$0xff] (!%p996_p6) }
 0x542   : > { %v881_v10 = vld [vmem:[#allocation2] sm:$0xff] (!%p996_p6)  ;;  %v882_v12 = vld [vmem:[#allocation2 + $0x8] sm:$0xff] (!%p996_p6)  ;;  %v884_v19 = vld [vmem:[#allocation2 + $0x18] sm:$0xff] (!%p996_p6)  ;;  %v894_v20 = vadd.f32 (!%p996_p6), %v997_v11, %v883_v18 }
 0x543   : > { %v892_v14 = vadd.f32 (!%p996_p6), %v997_v11, %v881_v10  ;;  %v893_v15 = vadd.f32 (!%p996_p6), %v997_v11, %v882_v12  ;;  %v895_v21 = vadd.f32 (!%p996_p6), %v997_v11, %v884_v19 }
 0x544   : > { %898 = vst.msk [vmem:[#allocation2 + $0x10] sm:$0xff] (!%p996_p6), %vm273_vm0, %v894_v20 }
 0x545   : > { %896 = vst.msk [vmem:[#allocation2] sm:$0xff] %vm273_vm0, %v892_v14  ;;  %897 = vst.msk [vmem:[#allocation2 + $0x8] sm:$0xff] %vm273_vm0, %v893_v15 }
 0x546   : > { %899 = vst.msk [vmem:[#allocation2 + $0x18] sm:$0xff] %vm273_vm0, %v895_v21 }
 0x547 PF: > { %p1374_p7 = scmp.eq.s32.totalorder %s970_s21, 3  ;;  %s1204_s18 = smov [#allocation2]  }
 0x548   : > { %s909_s23 = sshll.u32 %s1204_s18, 4  ;;  %s910_s23 = int_to_ptr.vmem [resolvable:$true] %s909_s23 }
 0x549   : > { %s1146_s24 = scalar_lea.vmem %s910_s23, 512  ;;  %p1153_p11 = scmp.lt.s32.totalorder %s910_s23, %s910_s23 }
 0x54a   : > { %p1147_p8 = scmp.ne.s32.totalorder %s910_s23, %s1146_s24  ;;  %p1154_p12 = scmp.lt.s32.totalorder %s1146_s24, %s1146_s24 }
 0x54c   : > { %p1148_p9 = pnand %p1147_p8, %p1374_p7  ;;  %p1155_p13 = por %p1154_p12, %p1153_p11 }
 0x54e   : > { %p1149_p10 = pneg %p1148_p9 }
 0x550   : > { %p1156_p0 = pnand %p1155_p13, %p1149_p10 }
 0x552   : > { %1159 = shalt.err (!%p1156_p0)
}
 0x553   : > { %s1160_s21 = scalar_lea.hbm %s1414_s5, 512 }
 0x554   : > { %p1161_p1 = scmp.ne.s32.totalorder %s1414_s5, %s1160_s21  ;;  %p1166_p4 = scmp.lt.u32.totalorder %s1160_s21, %s1414_s5 }
 0x556   : > { %p1162_p2 = pnand %p1161_p1, %p1374_p7 }
 0x558   : > { %p1163_p3 = pneg %p1162_p2 }
 0x55a   : > { %p1168_p5 = pnand %p1166_p4, %p1163_p3 }
 0x55c   : > { %1171 = shalt.err (!%p1168_p5)
}
 0x55d   : > { %s1205_s6 = smov 128   ;;  %s1206_s7 = smov 8  }
 0x55e   : > { %1090 = dma.vmem_to_hbm [thread:$0]  (%p1374_p7), %s910_s23, 512, %s1414_s5, [#allocation3], %s1205_s6, %s1205_s6, %s1206_s7  }
 0x55f   : > { %1185 = dma.done.wait (%p1374_p7), [#allocation3], 512  }
 0x560   : > { %1187 = vsyncadd (%p1374_p7), [#allocation3], 4294966784 }
 0x561 PF: > { %s16_s20 = sadd.s32 1, %s1198_s20   ;;  %s1416_s18 = smov %s1194_s19 }
 0x562   : > { %p13_p6 = scmp.ge.s32.totalorder %s16_s20, 6   ;;  %s1417_s19 = smov %s1419_s22 }
 0x564   :  { %15 = sbr.rel (!%p13_p6) target bundleno = 2 (0x2), region = 83 }
 0x56b   :  { %925 = vsyncpa [#allocation3], 1 }
 0x56c   :  { %927 = vsyncpa [#allocation3 + $0x1], 1 }

</bundles_post_ra>
